<compile_context>
chip_gen: v5e
topology: v5e:2x2
jax: 0.10.0
libtpu: 0.0.40
codegen_flags: <defaults>
</compile_context>

<pallas_src>
import functools
import math

import jax
import jax.numpy as jnp
from jax.experimental import pallas as pl
from jax.experimental.pallas import tpu as pltpu


def fused_encoder_kernel(x_ref,
                         wqkv_ref, wo_ref, w1_ref, w2_ref, vec_ref, b1_ref,
                         out_ref, act_ref,
                         *, num_heads, eps=1e-5, compute_dtype=jnp.bfloat16,
                         approx_recip=True):
    layer = pl.program_id(1)
    num_layers = pl.num_programs(1)

    # First layer for this batch tile: seed the resident activation from the input.
    @pl.when(layer == 0)
    def _():
        act_ref[...] = x_ref[...].astype(jnp.float32)

    x = act_ref[...]                       # (TB, S, D) f32, resident across layers
    TB, S, D = x.shape
    H = num_heads
    Dh = D // H
    N = TB * S

    # Packed per-layer vectors: rows = [bq*scale, bk, bv, bo, b2, ln1w, ln1b, ln2w, ln2b]
    vec = vec_ref[...]                     # (9, D) f32
    bq, bk, bv = vec[0:1, :], vec[1:2, :], vec[2:3, :]
    bo, b2 = vec[3:4, :], vec[4:5, :]
    ln1w, ln1b = vec[5:6, :], vec[6:7, :]
    ln2w, ln2b = vec[7:8, :], vec[8:9, :]

    x2 = x.reshape(N, D)                   # flatten batch tile -> MXU M dim = TB*S
    x_c = x2.astype(compute_dtype)

    # ---------------- fused QKV projection (one lane-dense (D, 3D) matmul) -------------
    # softmax scale is pre-folded into Wq / bq at repack time.
    qkv = jnp.dot(x_c, wqkv_ref[...], preferred_element_type=jnp.float32)   # (N, 3D)
    q3 = (qkv[:, 0 * D:1 * D] + bq).reshape(TB, S, D).astype(compute_dtype)
    k3 = (qkv[:, 1 * D:2 * D] + bk).reshape(TB, S, D).astype(compute_dtype)
    v3 = (qkv[:, 2 * D:3 * D] + bv).reshape(TB, S, D).astype(compute_dtype)

    wo = wo_ref[...]                       # (D, D) bf16, lane-dense

    # ---------------- multi-head attention (per-head scores / context) -----------------
    # Score / context matmuls are batched over the batch tile; each head folds its
    # context straight through its (Dh, D) sublane slice of the output projection.
    attn = jnp.zeros((N, D), jnp.float32)
    for h in range(H):                     # static unroll; H is small
        sl = slice(h * Dh, (h + 1) * Dh)
        s = jnp.einsum('bqd,bkd->bqk', q3[:, :, sl], k3[:, :, sl],
                       preferred_element_type=jnp.float32)          # (TB, S, S)
        s = s - jnp.max(s, axis=-1, keepdims=True)
        p = jnp.exp(s)
        denom = jnp.sum(p, axis=-1, keepdims=True)
        p = p * pl.reciprocal(denom, approx=approx_recip)
        ctx = jnp.einsum('bqk,bkd->bqd', p.astype(compute_dtype), v3[:, :, sl],
                         preferred_element_type=jnp.float32)        # (TB, S, Dh)
        attn = attn + jnp.dot(ctx.reshape(N, Dh).astype(compute_dtype), wo[sl, :],
                              preferred_element_type=jnp.float32)   # (N, D)
    attn = attn + bo

    # ---------------- residual + LayerNorm 1 (post-norm), f32 stats --------------------
    y = x2 + attn
    mu = jnp.mean(y, axis=-1, keepdims=True)
    var = jnp.mean(jnp.square(y - mu), axis=-1, keepdims=True)
    y = (y - mu) * jax.lax.rsqrt(var + eps) * ln1w + ln1b

    # ---------------- feed-forward: linear -> ReLU -> linear ---------------------------
    h1 = jnp.dot(y.astype(compute_dtype), w1_ref[...],
                 preferred_element_type=jnp.float32) + b1_ref[...]
    h1 = jnp.maximum(h1, 0.0)
    ff = jnp.dot(h1.astype(compute_dtype), w2_ref[...],
                 preferred_element_type=jnp.float32) + b2

    # ---------------- residual + LayerNorm 2 -------------------------------------------
    z = y + ff
    mu2 = jnp.mean(z, axis=-1, keepdims=True)
    var2 = jnp.mean(jnp.square(z - mu2), axis=-1, keepdims=True)
    z = (z - mu2) * jax.lax.rsqrt(var2 + eps) * ln2w + ln2b

    act_ref[...] = z.reshape(TB, S, D)     # carry to the next layer, VMEM-resident

    @pl.when(layer == num_layers - 1)
    def _():
        out_ref[...] = z.reshape(TB, S, D).astype(out_ref.dtype)


def _layer_indexed_spec(arr):
    """BlockSpec streaming one layer's slice of an (L, ...) stacked parameter array."""
    trailing = tuple(arr.shape[1:])
    zeros = (0,) * len(trailing)

    def index_map(b, l):
        return (l,) + zeros

    return pl.BlockSpec((pl.Squeezed(),) + trailing, index_map)


def _choose_batch_tile(B, S, max_rows=512):
    """Largest divisor of B keeping TB*S bounded, preferring >= 2 batch tiles (v7x)."""
    divisors = [d for d in range(1, B + 1) if B % d == 0]
    fitting = [d for d in divisors if d * S <= max_rows] or [1]
    tb = max(fitting)
    if tb == B and B > 1:
        smaller = [d for d in fitting if d < B]
        if smaller:
            tb = max(smaller)
    return tb


def kernel_transformer_encoder(src, stacked_params, num_heads, *,
                               mask=None, src_key_padding_mask=None, is_causal=False,
                               batch_tile=None, eps=1e-5,
                               compute_dtype=jnp.bfloat16, approx_recip=True,
                               vmem_limit_bytes=32 * 1024 * 1024):
    """Run the whole L-layer encoder stack in a single fused Pallas kernel."""
    # TODO(synk): masked / causal attention not implemented; refuse rather than be wrong.
    assert mask is None and src_key_padding_mask is None and not is_causal, (
        "src_mask / src_key_padding_mask / is_causal are not supported")

    B, S, D = src.shape
    w_qkv, w_o, w_1, w_2, vec_d, b_1 = stacked_params
    L = w_qkv.shape[0]
    FF = w_1.shape[-1]

    if batch_tile is None:
        batch_tile = _choose_batch_tile(B, S)
    TB = batch_tile
    assert B % TB == 0
    nbt = B // TB

    kern = functools.partial(fused_encoder_kernel, num_heads=num_heads, eps=eps,
                             compute_dtype=compute_dtype, approx_recip=approx_recip)

    x_spec = pl.BlockSpec((TB, S, D), lambda b, l: (b, 0, 0))
    out_spec = pl.BlockSpec((TB, S, D), lambda b, l: (b, 0, 0))

    # Advisory cost estimate for XLA's scheduler around the fused call.
    flops = int(2 * B * L * S * D * (4 * D + 2 * S + 2 * FF))
    transcendentals = int(B * L * num_heads * S * S + 2 * B * L * S)
    w_bytes = sum(int(w.size) * w.dtype.itemsize for w in stacked_params) * nbt
    bytes_accessed = int(2 * src.size * src.dtype.itemsize + w_bytes)

    return pl.pallas_call(
        kern,
        out_shape=jax.ShapeDtypeStruct((B, S, D), src.dtype),
        grid=(nbt, L),
        in_specs=[x_spec] + [_layer_indexed_spec(w) for w in stacked_params],
        out_specs=out_spec,
        scratch_shapes=[pltpu.VMEM((TB, S, D), jnp.float32)],
        compiler_params=pltpu.CompilerParams(
            dimension_semantics=("parallel", "arbitrary"),
            # v5e scoped default is only 16 MiB -> the explicit 32 MiB override matters
            # there; on v6e this can be raised (~64-96 MiB) for bigger tiles, on v7x
            # (64 MiB total) re-derive per-config before raising.
            vmem_limit_bytes=vmem_limit_bytes),
        cost_estimate=pl.CostEstimate(flops=flops,
                                      transcendentals=transcendentals,
                                      bytes_accessed=bytes_accessed),
    )(src, *stacked_params)


# --------------------------- parameter construction / repacking -----------------------

def _xavier_uniform(key, shape):
    fan_out, fan_in = shape
    bound = math.sqrt(6.0 / (fan_in + fan_out))
    return jax.random.uniform(key, shape, jnp.float32, -bound, bound)


def make_layer_params(key, d_model, nhead, dim_feedforward):
    """Per-layer parameters in the PyTorch nn.TransformerEncoderLayer convention."""
    ks = jax.random.split(key, 4)
    return dict(
        in_proj_w=_xavier_uniform(ks[0], (3 * d_model, d_model)),   # (3D, D)
        in_proj_b=jnp.zeros((3 * d_model,), jnp.float32),
        out_proj_w=_xavier_uniform(ks[1], (d_model, d_model)),       # (D, D)
        out_proj_b=jnp.zeros((d_model,), jnp.float32),
        lin1_w=_xavier_uniform(ks[2], (dim_feedforward, d_model)),   # (FF, D)
        lin1_b=jnp.zeros((dim_feedforward,), jnp.float32),
        lin2_w=_xavier_uniform(ks[3], (d_model, dim_feedforward)),   # (D, FF)
        lin2_b=jnp.zeros((d_model,), jnp.float32),
        ln1_w=jnp.ones((d_model,), jnp.float32),
        ln1_b=jnp.zeros((d_model,), jnp.float32),
        ln2_w=jnp.ones((d_model,), jnp.float32),
        ln2_b=jnp.zeros((d_model,), jnp.float32),
    )


def prepare_stacked_params(layer_param_list, nhead, compute_dtype=jnp.bfloat16):
    """One-time wrapper-side repack: pre-transpose, fuse QKV, fold the softmax scale,
    pack small vectors, stack over layers.

    Matmul weights are stored lane-dense in `compute_dtype` (bf16 by default) so the
    kernel feeds the MXU directly; biases and LayerNorm parameters stay f32 and are
    packed into a single (9, D) slab plus one (1, FF) slab per layer.
    """
    def per_layer(p):
        D = p['out_proj_w'].shape[0]
        FF = p['lin1_w'].shape[0]
        Dh = D // nhead
        scale = 1.0 / math.sqrt(Dh)

        wq, wk, wv = jnp.split(p['in_proj_w'], 3, axis=0)            # each (D, D)
        w_qkv = jnp.concatenate([wq.T * scale, wk.T, wv.T], axis=1)  # (D, 3D)
        w_o = jnp.transpose(p['out_proj_w'])                         # (D, D)
        w_1 = jnp.transpose(p['lin1_w'])                             # (D, FF)
        w_2 = jnp.transpose(p['lin2_w'])                             # (FF, D)

        bq, bk, bv = jnp.split(p['in_proj_b'], 3)
        vec_d = jnp.stack([bq * scale, bk, bv,
                           p['out_proj_b'], p['lin2_b'],
                           p['ln1_w'], p['ln1_b'],
                           p['ln2_w'], p['ln2_b']], axis=0)          # (9, D) f32
        b_1 = p['lin1_b'].reshape(1, FF)                             # (1, FF) f32

        return (w_qkv.astype(compute_dtype), w_o.astype(compute_dtype),
                w_1.astype(compute_dtype), w_2.astype(compute_dtype),
                vec_d.astype(jnp.float32), b_1.astype(jnp.float32))

    per = [per_layer(p) for p in layer_param_list]
    return tuple(jnp.stack([lp[i] for lp in per], axis=0) for i in range(len(per[0])))


if __name__ == "__main__":
    B, S, D = 2, 8, 32          # batch, seq, d_model
    NHEAD = 4
    FF = 64
    NUM_LAYERS = 2

    key = jax.random.PRNGKey(0)
    k_src, k_params = jax.random.split(key)
    src = jax.random.normal(k_src, (B, S, D), jnp.float32)

    # _get_clones deep-copies the same encoder_layer -> identical initial params per layer.
    layer_p = make_layer_params(k_params, D, NHEAD, FF)
    stacked = prepare_stacked_params([layer_p] * NUM_LAYERS, NHEAD)

    out = kernel_transformer_encoder(src, stacked, NHEAD)
    jax.block_until_ready(out)
    assert out.shape == (B, S, D) and out.dtype == jnp.float32
    print("KERNEL_OK")
</pallas_src>

<mosaic_0001>
module attributes {stable_mosaic.version = 11 : i64} {
  func.func @fused_encoder_kernel(%arg0: i32, %arg1: i32, %arg2: memref<1x8x32xf32, #tpu.memory_space<vmem>>, %arg3: memref<1x32x96xbf16, #tpu.memory_space<vmem>>, %arg4: memref<1x32x32xbf16, #tpu.memory_space<vmem>>, %arg5: memref<1x32x64xbf16, #tpu.memory_space<vmem>>, %arg6: memref<1x64x32xbf16, #tpu.memory_space<vmem>>, %arg7: memref<1x9x32xf32, #tpu.memory_space<vmem>>, %arg8: memref<1x1x64xf32, #tpu.memory_space<vmem>>, %arg9: memref<1x8x32xf32, #tpu.memory_space<vmem>>, %arg10: memref<1x8x32xf32, #tpu.memory_space<vmem>>) attributes {dimension_semantics = [#tpu.dimension_semantics<parallel>, #tpu.dimension_semantics<arbitrary>], iteration_bounds = array<i64: 2, 2>, scalar_prefetch = 0 : i64, scratch_operands = 1 : i64, tpu.core_type = #tpu.core_type<tc>, window_params = [{transform_indices = @transform_0, window_bounds = array<i64: 1, 8, 32>}, {transform_indices = @transform_1, window_bounds = array<i64: 1, 32, 96>}, {transform_indices = @transform_2, window_bounds = array<i64: 1, 32, 32>}, {transform_indices = @transform_3, window_bounds = array<i64: 1, 32, 64>}, {transform_indices = @transform_4, window_bounds = array<i64: 1, 64, 32>}, {transform_indices = @transform_5, window_bounds = array<i64: 1, 9, 32>}, {transform_indices = @transform_6, window_bounds = array<i64: 1, 1, 64>}, {transform_indices = @transform_7, window_bounds = array<i64: 1, 8, 32>}]} {
    %c0_i32 = arith.constant 0 : i32
    %0 = arith.cmpi eq, %arg1, %c0_i32 : i32
    %1 = arith.extui %0 : i1 to i32
    %c0_i32_0 = arith.constant 0 : i32
    %2 = arith.cmpi ne, %1, %c0_i32_0 : i32
    scf.if %2 {
      %c0_59 = arith.constant 0 : index
      %c0_60 = arith.constant 0 : index
      %c0_61 = arith.constant 0 : index
      %191 = vector.load %arg2[%c0_59, %c0_60, %c0_61] : memref<1x8x32xf32, #tpu.memory_space<vmem>>, vector<1x8x32xf32>
      %c0_62 = arith.constant 0 : index
      %c0_63 = arith.constant 0 : index
      %c0_64 = arith.constant 0 : index
      %192 = vector.load %arg10[%c0_62, %c0_63, %c0_64] : memref<1x8x32xf32, #tpu.memory_space<vmem>>, vector<1x8x32xf32>
      tpu.vector_store %arg10[%c0_62, %c0_63, %c0_64], %191 {strides = array<i32>} : memref<1x8x32xf32, #tpu.memory_space<vmem>>, vector<1x8x32xf32>,
    } else {
    }
    %c0 = arith.constant 0 : index
    %c0_1 = arith.constant 0 : index
    %c0_2 = arith.constant 0 : index
    %3 = vector.load %arg10[%c0, %c0_1, %c0_2] : memref<1x8x32xf32, #tpu.memory_space<vmem>>, vector<1x8x32xf32>
    %c0_3 = arith.constant 0 : index
    %c0_4 = arith.constant 0 : index
    %c0_5 = arith.constant 0 : index
    %4 = vector.load %arg7[%c0_3, %c0_4, %c0_5] : memref<1x9x32xf32, #tpu.memory_space<vmem>>, vector<1x9x32xf32>
    %5 = vector.shape_cast %4 : vector<1x9x32xf32> to vector<9x32xf32>
    %6 = vector.extract_strided_slice %5 {offsets = [0, 0], sizes = [1, 32], strides = [1, 1]} : vector<9x32xf32> to vector<1x32xf32>
    %7 = vector.extract_strided_slice %5 {offsets = [1, 0], sizes = [1, 32], strides = [1, 1]} : vector<9x32xf32> to vector<1x32xf32>
    %8 = vector.extract_strided_slice %5 {offsets = [2, 0], sizes = [1, 32], strides = [1, 1]} : vector<9x32xf32> to vector<1x32xf32>
    %9 = vector.extract_strided_slice %5 {offsets = [3, 0], sizes = [1, 32], strides = [1, 1]} : vector<9x32xf32> to vector<1x32xf32>
    %10 = vector.extract_strided_slice %5 {offsets = [4, 0], sizes = [1, 32], strides = [1, 1]} : vector<9x32xf32> to vector<1x32xf32>
    %11 = vector.extract_strided_slice %5 {offsets = [5, 0], sizes = [1, 32], strides = [1, 1]} : vector<9x32xf32> to vector<1x32xf32>
    %12 = vector.extract_strided_slice %5 {offsets = [6, 0], sizes = [1, 32], strides = [1, 1]} : vector<9x32xf32> to vector<1x32xf32>
    %13 = vector.extract_strided_slice %5 {offsets = [7, 0], sizes = [1, 32], strides = [1, 1]} : vector<9x32xf32> to vector<1x32xf32>
    %14 = vector.extract_strided_slice %5 {offsets = [8, 0], sizes = [1, 32], strides = [1, 1]} : vector<9x32xf32> to vector<1x32xf32>
    %15 = vector.shape_cast %3 : vector<1x8x32xf32> to vector<8x32xf32>
    %16 = arith.truncf %15 : vector<8x32xf32> to vector<8x32xbf16>
    %c0_6 = arith.constant 0 : index
    %c0_7 = arith.constant 0 : index
    %c0_8 = arith.constant 0 : index
    %17 = vector.load %arg3[%c0_6, %c0_7, %c0_8] : memref<1x32x96xbf16, #tpu.memory_space<vmem>>, vector<1x32x96xbf16>
    %18 = vector.shape_cast %17 : vector<1x32x96xbf16> to vector<32x96xbf16>
    %cst = arith.constant dense<0.000000e+00> : vector<8x96xf32>
    %19 = tpu.matmul %16, %18, %cst {dimension_numbers = #tpu.dot_dimension_numbers<[1], [0], [0], [1], [0, 0, 1, 1], [], []>} : vector<8x32xbf16>, vector<32x96xbf16>, vector<8x96xf32> -> vector<8x96xf32>
    %20 = vector.extract_strided_slice %19 {offsets = [0, 0], sizes = [8, 32], strides = [1, 1]} : vector<8x96xf32> to vector<8x32xf32>
    %21 = vector.broadcast %6 : vector<1x32xf32> to vector<8x32xf32>
    %22 = arith.addf %20, %21 : vector<8x32xf32>
    %23 = vector.shape_cast %22 : vector<8x32xf32> to vector<1x8x32xf32>
    %24 = arith.truncf %23 : vector<1x8x32xf32> to vector<1x8x32xbf16>
    %25 = vector.extract_strided_slice %19 {offsets = [0, 32], sizes = [8, 32], strides = [1, 1]} : vector<8x96xf32> to vector<8x32xf32>
    %26 = vector.broadcast %7 : vector<1x32xf32> to vector<8x32xf32>
    %27 = arith.addf %25, %26 : vector<8x32xf32>
    %28 = vector.shape_cast %27 : vector<8x32xf32> to vector<1x8x32xf32>
    %29 = arith.truncf %28 : vector<1x8x32xf32> to vector<1x8x32xbf16>
    %30 = vector.extract_strided_slice %19 {offsets = [0, 64], sizes = [8, 32], strides = [1, 1]} : vector<8x96xf32> to vector<8x32xf32>
    %31 = vector.broadcast %8 : vector<1x32xf32> to vector<8x32xf32>
    %32 = arith.addf %30, %31 : vector<8x32xf32>
    %33 = vector.shape_cast %32 : vector<8x32xf32> to vector<1x8x32xf32>
    %34 = arith.truncf %33 : vector<1x8x32xf32> to vector<1x8x32xbf16>
    %c0_9 = arith.constant 0 : index
    %c0_10 = arith.constant 0 : index
    %c0_11 = arith.constant 0 : index
    %35 = vector.load %arg4[%c0_9, %c0_10, %c0_11] : memref<1x32x32xbf16, #tpu.memory_space<vmem>>, vector<1x32x32xbf16>
    %36 = vector.shape_cast %35 : vector<1x32x32xbf16> to vector<32x32xbf16>
    %cst_12 = arith.constant 0.000000e+00 : f32
    %37 = vector.broadcast %cst_12 : f32 to vector<8x32xf32>
    %38 = vector.extract_strided_slice %24 {offsets = [0, 0, 0], sizes = [1, 8, 8], strides = [1, 1, 1]} : vector<1x8x32xbf16> to vector<1x8x8xbf16>
    %39 = vector.extract_strided_slice %29 {offsets = [0, 0, 0], sizes = [1, 8, 8], strides = [1, 1, 1]} : vector<1x8x32xbf16> to vector<1x8x8xbf16>
    "tpu.trace_start"() <{level = 10 : i32, message = "bqd,bkd->bqk"}> : () -> ()
    %cst_13 = arith.constant dense<0.000000e+00> : vector<1x8x8xf32>
    %40 = tpu.matmul %38, %39, %cst_13 {dimension_numbers = #tpu.dot_dimension_numbers<[2], [2], [1], [1], [0, 0, 0, 1, 1, 1], [0], [0]>} : vector<1x8x8xbf16>, vector<1x8x8xbf16>, vector<1x8x8xf32> -> vector<1x8x8xf32>
    "tpu.trace_stop"() : () -> ()
    %cst_14 = arith.constant dense<0xFF800000> : vector<1x8xf32>
    %41 = vector.multi_reduction <maximumf>, %40, %cst_14 [2] : vector<1x8x8xf32> to vector<1x8xf32>
    %42 = vector.shape_cast %41 : vector<1x8xf32> to vector<1x8x1xf32>
    %43 = vector.broadcast %42 : vector<1x8x1xf32> to vector<1x8x8xf32>
    %44 = arith.subf %40, %43 : vector<1x8x8xf32>
    %45 = math.exp %44 : vector<1x8x8xf32>
    %cst_15 = arith.constant dense<0.000000e+00> : vector<1x8xf32>
    %46 = vector.multi_reduction <add>, %45, %cst_15 [2] : vector<1x8x8xf32> to vector<1x8xf32>
    %47 = vector.shape_cast %46 : vector<1x8xf32> to vector<1x8x1xf32>
    %48 = tpu.reciprocal %47 {approx = true} : vector<1x8x1xf32> -> vector<1x8x1xf32>
    %49 = vector.broadcast %48 : vector<1x8x1xf32> to vector<1x8x8xf32>
    %50 = arith.mulf %45, %49 : vector<1x8x8xf32>
    %51 = arith.truncf %50 : vector<1x8x8xf32> to vector<1x8x8xbf16>
    %52 = vector.extract_strided_slice %34 {offsets = [0, 0, 0], sizes = [1, 8, 8], strides = [1, 1, 1]} : vector<1x8x32xbf16> to vector<1x8x8xbf16>
    "tpu.trace_start"() <{level = 10 : i32, message = "bqk,bkd->bqd"}> : () -> ()
    %cst_16 = arith.constant dense<0.000000e+00> : vector<1x8x8xf32>
    %53 = tpu.matmul %51, %52, %cst_16 {dimension_numbers = #tpu.dot_dimension_numbers<[2], [1], [1], [2], [0, 0, 0, 1, 1, 2], [0], [0]>} : vector<1x8x8xbf16>, vector<1x8x8xbf16>, vector<1x8x8xf32> -> vector<1x8x8xf32>
    "tpu.trace_stop"() : () -> ()
    %54 = vector.shape_cast %53 : vector<1x8x8xf32> to vector<8x8xf32>
    %55 = arith.truncf %54 : vector<8x8xf32> to vector<8x8xbf16>
    %56 = vector.extract_strided_slice %36 {offsets = [0, 0], sizes = [8, 32], strides = [1, 1]} : vector<32x32xbf16> to vector<8x32xbf16>
    %cst_17 = arith.constant dense<0.000000e+00> : vector<8x32xf32>
    %57 = tpu.matmul %55, %56, %cst_17 {dimension_numbers = #tpu.dot_dimension_numbers<[1], [0], [0], [1], [0, 0, 1, 1], [], []>} : vector<8x8xbf16>, vector<8x32xbf16>, vector<8x32xf32> -> vector<8x32xf32>
    %58 = arith.addf %37, %57 : vector<8x32xf32>
    %59 = vector.extract_strided_slice %24 {offsets = [0, 0, 8], sizes = [1, 8, 8], strides = [1, 1, 1]} : vector<1x8x32xbf16> to vector<1x8x8xbf16>
    %60 = vector.extract_strided_slice %29 {offsets = [0, 0, 8], sizes = [1, 8, 8], strides = [1, 1, 1]} : vector<1x8x32xbf16> to vector<1x8x8xbf16>
    "tpu.trace_start"() <{level = 10 : i32, message = "bqd,bkd->bqk"}> : () -> ()
    %cst_18 = arith.constant dense<0.000000e+00> : vector<1x8x8xf32>
    %61 = tpu.matmul %59, %60, %cst_18 {dimension_numbers = #tpu.dot_dimension_numbers<[2], [2], [1], [1], [0, 0, 0, 1, 1, 1], [0], [0]>} : vector<1x8x8xbf16>, vector<1x8x8xbf16>, vector<1x8x8xf32> -> vector<1x8x8xf32>
    "tpu.trace_stop"() : () -> ()
    %cst_19 = arith.constant dense<0xFF800000> : vector<1x8xf32>
    %62 = vector.multi_reduction <maximumf>, %61, %cst_19 [2] : vector<1x8x8xf32> to vector<1x8xf32>
    %63 = vector.shape_cast %62 : vector<1x8xf32> to vector<1x8x1xf32>
    %64 = vector.broadcast %63 : vector<1x8x1xf32> to vector<1x8x8xf32>
    %65 = arith.subf %61, %64 : vector<1x8x8xf32>
    %66 = math.exp %65 : vector<1x8x8xf32>
    %cst_20 = arith.constant dense<0.000000e+00> : vector<1x8xf32>
    %67 = vector.multi_reduction <add>, %66, %cst_20 [2] : vector<1x8x8xf32> to vector<1x8xf32>
    %68 = vector.shape_cast %67 : vector<1x8xf32> to vector<1x8x1xf32>
    %69 = tpu.reciprocal %68 {approx = true} : vector<1x8x1xf32> -> vector<1x8x1xf32>
    %70 = vector.broadcast %69 : vector<1x8x1xf32> to vector<1x8x8xf32>
    %71 = arith.mulf %66, %70 : vector<1x8x8xf32>
    %72 = arith.truncf %71 : vector<1x8x8xf32> to vector<1x8x8xbf16>
    %73 = vector.extract_strided_slice %34 {offsets = [0, 0, 8], sizes = [1, 8, 8], strides = [1, 1, 1]} : vector<1x8x32xbf16> to vector<1x8x8xbf16>
    "tpu.trace_start"() <{level = 10 : i32, message = "bqk,bkd->bqd"}> : () -> ()
    %cst_21 = arith.constant dense<0.000000e+00> : vector<1x8x8xf32>
    %74 = tpu.matmul %72, %73, %cst_21 {dimension_numbers = #tpu.dot_dimension_numbers<[2], [1], [1], [2], [0, 0, 0, 1, 1, 2], [0], [0]>} : vector<1x8x8xbf16>, vector<1x8x8xbf16>, vector<1x8x8xf32> -> vector<1x8x8xf32>
    "tpu.trace_stop"() : () -> ()
    %75 = vector.shape_cast %74 : vector<1x8x8xf32> to vector<8x8xf32>
    %76 = arith.truncf %75 : vector<8x8xf32> to vector<8x8xbf16>
    %77 = vector.extract_strided_slice %36 {offsets = [8, 0], sizes = [8, 32], strides = [1, 1]} : vector<32x32xbf16> to vector<8x32xbf16>
    %cst_22 = arith.constant dense<0.000000e+00> : vector<8x32xf32>
    %78 = tpu.matmul %76, %77, %cst_22 {dimension_numbers = #tpu.dot_dimension_numbers<[1], [0], [0], [1], [0, 0, 1, 1], [], []>} : vector<8x8xbf16>, vector<8x32xbf16>, vector<8x32xf32> -> vector<8x32xf32>
    %79 = arith.addf %58, %78 : vector<8x32xf32>
    %80 = vector.extract_strided_slice %24 {offsets = [0, 0, 16], sizes = [1, 8, 8], strides = [1, 1, 1]} : vector<1x8x32xbf16> to vector<1x8x8xbf16>
    %81 = vector.extract_strided_slice %29 {offsets = [0, 0, 16], sizes = [1, 8, 8], strides = [1, 1, 1]} : vector<1x8x32xbf16> to vector<1x8x8xbf16>
    "tpu.trace_start"() <{level = 10 : i32, message = "bqd,bkd->bqk"}> : () -> ()
    %cst_23 = arith.constant dense<0.000000e+00> : vector<1x8x8xf32>
    %82 = tpu.matmul %80, %81, %cst_23 {dimension_numbers = #tpu.dot_dimension_numbers<[2], [2], [1], [1], [0, 0, 0, 1, 1, 1], [0], [0]>} : vector<1x8x8xbf16>, vector<1x8x8xbf16>, vector<1x8x8xf32> -> vector<1x8x8xf32>
    "tpu.trace_stop"() : () -> ()
    %cst_24 = arith.constant dense<0xFF800000> : vector<1x8xf32>
    %83 = vector.multi_reduction <maximumf>, %82, %cst_24 [2] : vector<1x8x8xf32> to vector<1x8xf32>
    %84 = vector.shape_cast %83 : vector<1x8xf32> to vector<1x8x1xf32>
    %85 = vector.broadcast %84 : vector<1x8x1xf32> to vector<1x8x8xf32>
    %86 = arith.subf %82, %85 : vector<1x8x8xf32>
    %87 = math.exp %86 : vector<1x8x8xf32>
    %cst_25 = arith.constant dense<0.000000e+00> : vector<1x8xf32>
    %88 = vector.multi_reduction <add>, %87, %cst_25 [2] : vector<1x8x8xf32> to vector<1x8xf32>
    %89 = vector.shape_cast %88 : vector<1x8xf32> to vector<1x8x1xf32>
    %90 = tpu.reciprocal %89 {approx = true} : vector<1x8x1xf32> -> vector<1x8x1xf32>
    %91 = vector.broadcast %90 : vector<1x8x1xf32> to vector<1x8x8xf32>
    %92 = arith.mulf %87, %91 : vector<1x8x8xf32>
    %93 = arith.truncf %92 : vector<1x8x8xf32> to vector<1x8x8xbf16>
    %94 = vector.extract_strided_slice %34 {offsets = [0, 0, 16], sizes = [1, 8, 8], strides = [1, 1, 1]} : vector<1x8x32xbf16> to vector<1x8x8xbf16>
    "tpu.trace_start"() <{level = 10 : i32, message = "bqk,bkd->bqd"}> : () -> ()
    %cst_26 = arith.constant dense<0.000000e+00> : vector<1x8x8xf32>
    %95 = tpu.matmul %93, %94, %cst_26 {dimension_numbers = #tpu.dot_dimension_numbers<[2], [1], [1], [2], [0, 0, 0, 1, 1, 2], [0], [0]>} : vector<1x8x8xbf16>, vector<1x8x8xbf16>, vector<1x8x8xf32> -> vector<1x8x8xf32>
    "tpu.trace_stop"() : () -> ()
    %96 = vector.shape_cast %95 : vector<1x8x8xf32> to vector<8x8xf32>
    %97 = arith.truncf %96 : vector<8x8xf32> to vector<8x8xbf16>
    %98 = vector.extract_strided_slice %36 {offsets = [16, 0], sizes = [8, 32], strides = [1, 1]} : vector<32x32xbf16> to vector<8x32xbf16>
    %cst_27 = arith.constant dense<0.000000e+00> : vector<8x32xf32>
    %99 = tpu.matmul %97, %98, %cst_27 {dimension_numbers = #tpu.dot_dimension_numbers<[1], [0], [0], [1], [0, 0, 1, 1], [], []>} : vector<8x8xbf16>, vector<8x32xbf16>, vector<8x32xf32> -> vector<8x32xf32>
    %100 = arith.addf %79, %99 : vector<8x32xf32>
    %101 = vector.extract_strided_slice %24 {offsets = [0, 0, 24], sizes = [1, 8, 8], strides = [1, 1, 1]} : vector<1x8x32xbf16> to vector<1x8x8xbf16>
    %102 = vector.extract_strided_slice %29 {offsets = [0, 0, 24], sizes = [1, 8, 8], strides = [1, 1, 1]} : vector<1x8x32xbf16> to vector<1x8x8xbf16>
    "tpu.trace_start"() <{level = 10 : i32, message = "bqd,bkd->bqk"}> : () -> ()
    %cst_28 = arith.constant dense<0.000000e+00> : vector<1x8x8xf32>
    %103 = tpu.matmul %101, %102, %cst_28 {dimension_numbers = #tpu.dot_dimension_numbers<[2], [2], [1], [1], [0, 0, 0, 1, 1, 1], [0], [0]>} : vector<1x8x8xbf16>, vector<1x8x8xbf16>, vector<1x8x8xf32> -> vector<1x8x8xf32>
    "tpu.trace_stop"() : () -> ()
    %cst_29 = arith.constant dense<0xFF800000> : vector<1x8xf32>
    %104 = vector.multi_reduction <maximumf>, %103, %cst_29 [2] : vector<1x8x8xf32> to vector<1x8xf32>
    %105 = vector.shape_cast %104 : vector<1x8xf32> to vector<1x8x1xf32>
    %106 = vector.broadcast %105 : vector<1x8x1xf32> to vector<1x8x8xf32>
    %107 = arith.subf %103, %106 : vector<1x8x8xf32>
    %108 = math.exp %107 : vector<1x8x8xf32>
    %cst_30 = arith.constant dense<0.000000e+00> : vector<1x8xf32>
    %109 = vector.multi_reduction <add>, %108, %cst_30 [2] : vector<1x8x8xf32> to vector<1x8xf32>
    %110 = vector.shape_cast %109 : vector<1x8xf32> to vector<1x8x1xf32>
    %111 = tpu.reciprocal %110 {approx = true} : vector<1x8x1xf32> -> vector<1x8x1xf32>
    %112 = vector.broadcast %111 : vector<1x8x1xf32> to vector<1x8x8xf32>
    %113 = arith.mulf %108, %112 : vector<1x8x8xf32>
    %114 = arith.truncf %113 : vector<1x8x8xf32> to vector<1x8x8xbf16>
    %115 = vector.extract_strided_slice %34 {offsets = [0, 0, 24], sizes = [1, 8, 8], strides = [1, 1, 1]} : vector<1x8x32xbf16> to vector<1x8x8xbf16>
    "tpu.trace_start"() <{level = 10 : i32, message = "bqk,bkd->bqd"}> : () -> ()
    %cst_31 = arith.constant dense<0.000000e+00> : vector<1x8x8xf32>
    %116 = tpu.matmul %114, %115, %cst_31 {dimension_numbers = #tpu.dot_dimension_numbers<[2], [1], [1], [2], [0, 0, 0, 1, 1, 2], [0], [0]>} : vector<1x8x8xbf16>, vector<1x8x8xbf16>, vector<1x8x8xf32> -> vector<1x8x8xf32>
    "tpu.trace_stop"() : () -> ()
    %117 = vector.shape_cast %116 : vector<1x8x8xf32> to vector<8x8xf32>
    %118 = arith.truncf %117 : vector<8x8xf32> to vector<8x8xbf16>
    %119 = vector.extract_strided_slice %36 {offsets = [24, 0], sizes = [8, 32], strides = [1, 1]} : vector<32x32xbf16> to vector<8x32xbf16>
    %cst_32 = arith.constant dense<0.000000e+00> : vector<8x32xf32>
    %120 = tpu.matmul %118, %119, %cst_32 {dimension_numbers = #tpu.dot_dimension_numbers<[1], [0], [0], [1], [0, 0, 1, 1], [], []>} : vector<8x8xbf16>, vector<8x32xbf16>, vector<8x32xf32> -> vector<8x32xf32>
    %121 = arith.addf %100, %120 : vector<8x32xf32>
    %122 = vector.broadcast %9 : vector<1x32xf32> to vector<8x32xf32>
    %123 = arith.addf %121, %122 : vector<8x32xf32>
    %124 = arith.addf %15, %123 : vector<8x32xf32>
    %cst_33 = arith.constant dense<0.000000e+00> : vector<8xf32>
    %125 = vector.multi_reduction <add>, %124, %cst_33 [1] : vector<8x32xf32> to vector<8xf32>
    %126 = vector.shape_cast %125 : vector<8xf32> to vector<8x1xf32>
    %cst_34 = arith.constant 3.200000e+01 : f32
    %127 = vector.broadcast %cst_34 : f32 to vector<8x1xf32>
    %128 = arith.divf %126, %127 : vector<8x1xf32>
    %129 = vector.broadcast %128 : vector<8x1xf32> to vector<8x32xf32>
    %130 = arith.subf %124, %129 : vector<8x32xf32>
    %131 = arith.mulf %130, %130 : vector<8x32xf32>
    %cst_35 = arith.constant dense<0.000000e+00> : vector<8xf32>
    %132 = vector.multi_reduction <add>, %131, %cst_35 [1] : vector<8x32xf32> to vector<8xf32>
    %133 = vector.shape_cast %132 : vector<8xf32> to vector<8x1xf32>
    %cst_36 = arith.constant 3.200000e+01 : f32
    %134 = vector.broadcast %cst_36 : f32 to vector<8x1xf32>
    %135 = arith.divf %133, %134 : vector<8x1xf32>
    %136 = vector.broadcast %128 : vector<8x1xf32> to vector<8x32xf32>
    %137 = arith.subf %124, %136 : vector<8x32xf32>
    %cst_37 = arith.constant 9.99999974E-6 : f32
    %138 = vector.broadcast %cst_37 : f32 to vector<8x1xf32>
    %139 = arith.addf %135, %138 : vector<8x1xf32>
    %140 = math.rsqrt %139 : vector<8x1xf32>
    %141 = vector.broadcast %140 : vector<8x1xf32> to vector<8x32xf32>
    %142 = arith.mulf %137, %141 : vector<8x32xf32>
    %143 = vector.broadcast %11 : vector<1x32xf32> to vector<8x32xf32>
    %144 = arith.mulf %142, %143 : vector<8x32xf32>
    %145 = vector.broadcast %12 : vector<1x32xf32> to vector<8x32xf32>
    %146 = arith.addf %144, %145 : vector<8x32xf32>
    %147 = arith.truncf %146 : vector<8x32xf32> to vector<8x32xbf16>
    %c0_38 = arith.constant 0 : index
    %c0_39 = arith.constant 0 : index
    %c0_40 = arith.constant 0 : index
    %148 = vector.load %arg5[%c0_38, %c0_39, %c0_40] : memref<1x32x64xbf16, #tpu.memory_space<vmem>>, vector<1x32x64xbf16>
    %149 = vector.shape_cast %148 : vector<1x32x64xbf16> to vector<32x64xbf16>
    %cst_41 = arith.constant dense<0.000000e+00> : vector<8x64xf32>
    %150 = tpu.matmul %147, %149, %cst_41 {dimension_numbers = #tpu.dot_dimension_numbers<[1], [0], [0], [1], [0, 0, 1, 1], [], []>} : vector<8x32xbf16>, vector<32x64xbf16>, vector<8x64xf32> -> vector<8x64xf32>
    %c0_42 = arith.constant 0 : index
    %c0_43 = arith.constant 0 : index
    %c0_44 = arith.constant 0 : index
    %151 = vector.load %arg8[%c0_42, %c0_43, %c0_44] : memref<1x1x64xf32, #tpu.memory_space<vmem>>, vector<1x1x64xf32>
    %152 = vector.shape_cast %151 : vector<1x1x64xf32> to vector<1x64xf32>
    %153 = vector.broadcast %152 : vector<1x64xf32> to vector<8x64xf32>
    %154 = arith.addf %150, %153 : vector<8x64xf32>
    %cst_45 = arith.constant 0.000000e+00 : f32
    %155 = vector.broadcast %cst_45 : f32 to vector<8x64xf32>
    %156 = arith.maximumf %154, %155 : vector<8x64xf32>
    %157 = arith.truncf %156 : vector<8x64xf32> to vector<8x64xbf16>
    %c0_46 = arith.constant 0 : index
    %c0_47 = arith.constant 0 : index
    %c0_48 = arith.constant 0 : index
    %158 = vector.load %arg6[%c0_46, %c0_47, %c0_48] : memref<1x64x32xbf16, #tpu.memory_space<vmem>>, vector<1x64x32xbf16>
    %159 = vector.shape_cast %158 : vector<1x64x32xbf16> to vector<64x32xbf16>
    %cst_49 = arith.constant dense<0.000000e+00> : vector<8x32xf32>
    %160 = tpu.matmul %157, %159, %cst_49 {dimension_numbers = #tpu.dot_dimension_numbers<[1], [0], [0], [1], [0, 0, 1, 1], [], []>} : vector<8x64xbf16>, vector<64x32xbf16>, vector<8x32xf32> -> vector<8x32xf32>
    %161 = vector.broadcast %10 : vector<1x32xf32> to vector<8x32xf32>
    %162 = arith.addf %160, %161 : vector<8x32xf32>
    %163 = arith.addf %146, %162 : vector<8x32xf32>
    %cst_50 = arith.constant dense<0.000000e+00> : vector<8xf32>
    %164 = vector.multi_reduction <add>, %163, %cst_50 [1] : vector<8x32xf32> to vector<8xf32>
    %165 = vector.shape_cast %164 : vector<8xf32> to vector<8x1xf32>
    %cst_51 = arith.constant 3.200000e+01 : f32
    %166 = vector.broadcast %cst_51 : f32 to vector<8x1xf32>
    %167 = arith.divf %165, %166 : vector<8x1xf32>
    %168 = vector.broadcast %167 : vector<8x1xf32> to vector<8x32xf32>
    %169 = arith.subf %163, %168 : vector<8x32xf32>
    %170 = arith.mulf %169, %169 : vector<8x32xf32>
    %cst_52 = arith.constant dense<0.000000e+00> : vector<8xf32>
    %171 = vector.multi_reduction <add>, %170, %cst_52 [1] : vector<8x32xf32> to vector<8xf32>
    %172 = vector.shape_cast %171 : vector<8xf32> to vector<8x1xf32>
    %cst_53 = arith.constant 3.200000e+01 : f32
    %173 = vector.broadcast %cst_53 : f32 to vector<8x1xf32>
    %174 = arith.divf %172, %173 : vector<8x1xf32>
    %175 = vector.broadcast %167 : vector<8x1xf32> to vector<8x32xf32>
    %176 = arith.subf %163, %175 : vector<8x32xf32>
    %cst_54 = arith.constant 9.99999974E-6 : f32
    %177 = vector.broadcast %cst_54 : f32 to vector<8x1xf32>
    %178 = arith.addf %174, %177 : vector<8x1xf32>
    %179 = math.rsqrt %178 : vector<8x1xf32>
    %180 = vector.broadcast %179 : vector<8x1xf32> to vector<8x32xf32>
    %181 = arith.mulf %176, %180 : vector<8x32xf32>
    %182 = vector.broadcast %13 : vector<1x32xf32> to vector<8x32xf32>
    %183 = arith.mulf %181, %182 : vector<8x32xf32>
    %184 = vector.broadcast %14 : vector<1x32xf32> to vector<8x32xf32>
    %185 = arith.addf %183, %184 : vector<8x32xf32>
    %186 = vector.shape_cast %185 : vector<8x32xf32> to vector<1x8x32xf32>
    %c0_55 = arith.constant 0 : index
    %c0_56 = arith.constant 0 : index
    %c0_57 = arith.constant 0 : index
    %187 = vector.load %arg10[%c0_55, %c0_56, %c0_57] : memref<1x8x32xf32, #tpu.memory_space<vmem>>, vector<1x8x32xf32>
    tpu.vector_store %arg10[%c0_55, %c0_56, %c0_57], %186 {strides = array<i32>} : memref<1x8x32xf32, #tpu.memory_space<vmem>>, vector<1x8x32xf32>,
    %c1_i32 = arith.constant 1 : i32
    %188 = arith.cmpi eq, %arg1, %c1_i32 : i32
    %189 = arith.extui %188 : i1 to i32
    %c0_i32_58 = arith.constant 0 : i32
    %190 = arith.cmpi ne, %189, %c0_i32_58 : i32
    scf.if %190 {
      %191 = vector.shape_cast %185 : vector<8x32xf32> to vector<1x8x32xf32>
      %c0_59 = arith.constant 0 : index
      %c0_60 = arith.constant 0 : index
      %c0_61 = arith.constant 0 : index
      %192 = vector.load %arg9[%c0_59, %c0_60, %c0_61] : memref<1x8x32xf32, #tpu.memory_space<vmem>>, vector<1x8x32xf32>
      tpu.vector_store %arg9[%c0_59, %c0_60, %c0_61], %191 {strides = array<i32>} : memref<1x8x32xf32, #tpu.memory_space<vmem>>, vector<1x8x32xf32>,
    } else {
    }
    return
  }
  func.func @transform_0(%arg0: i32, %arg1: i32) -> (i32, i32, i32) {
    %c0_i32 = arith.constant 0 : i32
    %c0_i32_0 = arith.constant 0 : i32
    %c0_i32_1 = arith.constant 0 : i32
    return %arg0, %c0_i32, %c0_i32_0 : i32, i32, i32
  }
  func.func @transform_1(%arg0: i32, %arg1: i32) -> (i32, i32, i32) {
    %c0_i32 = arith.constant 0 : i32
    %c0_i32_0 = arith.constant 0 : i32
    %c0_i32_1 = arith.constant 0 : i32
    return %arg1, %c0_i32, %c0_i32_0 : i32, i32, i32
  }
  func.func @transform_2(%arg0: i32, %arg1: i32) -> (i32, i32, i32) {
    %c0_i32 = arith.constant 0 : i32
    %c0_i32_0 = arith.constant 0 : i32
    %c0_i32_1 = arith.constant 0 : i32
    return %arg1, %c0_i32, %c0_i32_0 : i32, i32, i32
  }
  func.func @transform_3(%arg0: i32, %arg1: i32) -> (i32, i32, i32) {
    %c0_i32 = arith.constant 0 : i32
    %c0_i32_0 = arith.constant 0 : i32
    %c0_i32_1 = arith.constant 0 : i32
    return %arg1, %c0_i32, %c0_i32_0 : i32, i32, i32
  }
  func.func @transform_4(%arg0: i32, %arg1: i32) -> (i32, i32, i32) {
    %c0_i32 = arith.constant 0 : i32
    %c0_i32_0 = arith.constant 0 : i32
    %c0_i32_1 = arith.constant 0 : i32
    return %arg1, %c0_i32, %c0_i32_0 : i32, i32, i32
  }
  func.func @transform_5(%arg0: i32, %arg1: i32) -> (i32, i32, i32) {
    %c0_i32 = arith.constant 0 : i32
    %c0_i32_0 = arith.constant 0 : i32
    %c0_i32_1 = arith.constant 0 : i32
    return %arg1, %c0_i32, %c0_i32_0 : i32, i32, i32
  }
  func.func @transform_6(%arg0: i32, %arg1: i32) -> (i32, i32, i32) {
    %c0_i32 = arith.constant 0 : i32
    %c0_i32_0 = arith.constant 0 : i32
    %c0_i32_1 = arith.constant 0 : i32
    return %arg1, %c0_i32, %c0_i32_0 : i32, i32, i32
  }
  func.func @transform_7(%arg0: i32, %arg1: i32) -> (i32, i32, i32) {
    %c0_i32 = arith.constant 0 : i32
    %c0_i32_0 = arith.constant 0 : i32
    %c0_i32_1 = arith.constant 0 : i32
    return %arg0, %c0_i32, %c0_i32_0 : i32, i32, i32
  }
}

</mosaic_0001>

<bundles_post_ra>
// kernel: tpu_custom_call.1
= control target key start
LH: loop header
LB: loop body
LE: loop exit
PB: predicated region body
PF: predicated region fallthrough
CT: control target
= control target key end

     0   :  { %s1678_s0 = inlined_call_operand.vmem [shape: f32[2,8,32], index: 0, kind: input, shape index: {}]   ;;  %s1679_s1 = inlined_call_operand.vmem [shape: bf16[2,32,96], index: 1, kind: input, shape index: {}]   ;;  %s1680_s2 = inlined_call_operand.vmem [shape: bf16[2,32,32], index: 2, kind: input, shape index: {}]   ;;  %s1681_s3 = inlined_call_operand.vmem [shape: bf16[2,32,64], index: 3, kind: input, shape index: {}]   ;;  %s1682_s4 = inlined_call_operand.vmem [shape: bf16[2,64,32], index: 4, kind: input, shape index: {}]   ;;  %s1683_s5 = inlined_call_operand.vmem [shape: f32[2,9,32], index: 5, kind: input, shape index: {}]   ;;  %s1684_s6 = inlined_call_operand.vmem [shape: f32[2,1,64], index: 6, kind: input, shape index: {}]   ;;  %s1685_s7 = inlined_call_operand.hbm [shape: f32[2,8,32], index: 7, kind: output, shape index: {}]  }
   0x1   :  { %1695 = sst [smem:[#allocation15_spill]] %s1678_s0 }
   0x2   :  { %12 = vsyncpa [#allocation4], 0 }
   0x3   :  { %14 = vsyncpa [#allocation4 + $0x1], 0  ;;  %s1434_s24 = smov 0   ;;  %s1436_s25 = smov 0  }
   0x4   :  { %s1438_s26 = smov 0   ;;  %s1440_s27 = smov 0  }
   0x5   :  { %s1442_s28 = smov 0   ;;  %s1444_s29 = smov 0  }
   0x6   :  { %s1446_s30 = smov 0   ;;  %s1448_s8 = smov 0  }
   0x7 LB: > { %1696 = sst [smem:[#allocation6_spill]] %s1351_s24  ;;  %s1094_s9 = sadd.s32 4294967295, %s1379_s8   ;;  %s1379_s8 = sphi %s1448_s8, %s20_s8   ;;  %s1375_s30 = sphi %s1446_s30, %s1717_s30   ;;  %s1371_s29 = sphi %s1444_s29, %s1720_s29   ;;  %s1367_s28 = sphi %s1442_s28, %s1715_s28   ;;  %s1363_s27 = sphi %s1440_s27, %s1714_s27   ;;  %s1359_s26 = sphi %s1438_s26, %s1713_s26   ;;  %s1355_s25 = sphi %s1436_s25, %s1719_s25   ;;  %s1351_s24 = sphi %s1434_s24, %s1718_s24  }
   0x8   : > { %1697 = sst [smem:[#allocation7_spill]] %s1359_s26  ;;  %s1095_s10 = sadd.s32 4294967294, %s1379_s8  }
   0x9   : > { %1698 = sst [smem:[#allocation8_spill]] %s1371_s29  ;;  %s29_s11 = sadd.s32 1, %s1371_s29 }
   0xa   : > { %1699 = sst [smem:[#allocation9_spill]] %s1375_s30  ;;  %p30_p0 = scmp.ge.s32.totalorder %s29_s11, 2 }
   0xb   : > { %1700 = sst [smem:[#allocation10_spill]] %s1379_s8  ;;  %s32_s12 = sadd.s32 1, %s1375_s30 }
   0xc   : > { %p231_p1 = scmp.ne.s32.totalorder %s1359_s26, %s1355_s25  ;;  %p232_p2 = scmp.eq.s32.totalorder %s1094_s9, 3 }
   0xd   : > { %s1722_s11 = smov (%p30_p0, %s29_s11), 0  ;;  %s1724_s12 = smov (!%p30_p0, %s32_s12), %s1375_s30 }
   0xe   : > { %1701 = sst [smem:[#allocation11_spill]] %s1722_s11  ;;  %p1483_p3 = por %p232_p2, %p231_p1 }
   0xf   : > { %p237_p4 = scmp.ne.s32.totalorder %s1355_s25, %s1351_s24  ;;  %p34_p5 = scmp.ge.s32.totalorder %s1724_s12, 2 }
  0x10   : > { %p238_p6 = scmp.eq.s32.totalorder %s1095_s10, 3  ;;  %p1098_p7 = scmp.ge.s32.totalorder %s1379_s8, 1 }
  0x11   : > { %p309_p8 = scmp.lt.s32.totalorder %s1379_s8, 5  ;;  %s1726_s12 = smov (%p34_p5, %s1724_s12), 0 }
  0x12   : > { %1703 = sst [smem:[#allocation12_spill]] %s1726_s12  ;;  %p1493_p9 = por %p238_p6, %p237_p4 }
  0x13   : > { %p310_p10 = pnand %p1098_p7, %p309_p8  ;;  %s218_s15 = ssub.s32 %s1375_s30, %s1726_s12 }
  0x14   : > { %s1704_s14 = scalar_select %p1493_p9, 1, 0 }
  0x15   : > { %s221_s16 = sadd.s32 1, %s1359_s26  ;;  %p219_p11 = scmp.eq.s32.totalorder %s218_s15, 0 }
  0x16   : > { %1705 = sst [smem:[#allocation13_spill]] %s1704_s14  ;;  %313 = sbr.rel (%p310_p10) target bundleno = 2313 (0x909), region = 48 }
  0x17   : > { %s1501_s17 = scalar_select %p219_p11, %s1359_s26, %s221_s16  }
  0x18   : > { %s1687_s18 = sand.u32 (!%p310_p10), 1, %s1355_s25   ;;  %p368_p12 = scmp.lt.s32.totalorder (!%p310_p10), %s1367_s28, 1 }
  0x19   : > { %1706 = sst [smem:[#allocation14_spill]] %s1501_s17  ;;  %s1507_s19 = sshll.u32 (!%p310_p10), %s1687_s18, 3 }
  0x1a   : > { %p372_p13 = scmp.lt.s32.totalorder (!%p310_p10), %s1363_s27, 1  ;;  %s1707_s0 = sld [smem:[#allocation15_spill]] (!%p310_p10) }
  0x1b   : > { %s369_s20 = scalar_select %p368_p12, %s1367_s28, 1 }
  0x1c   : > { %s1512_s21 = scalar_select %p372_p13, %s1363_s27, 1 }
  0x1d   : > { %s1100_s22 = sshll.u32 %s369_s20, 3  ;;  %p1111_p0 = scmp.ne.s32.totalorder %s1363_s27, 0 }
  0x1e   : > { %s1164_s15 = sshll.u32 %s1512_s21, 4  ;;  %s1167_s20 = sshll.u32 %s1512_s21, 5 }
  0x1f   : > { %s376_s11 = scalar_lea.vmem %s1679_s1, %s1164_s15  ;;  %s1524_s29 = scalar_lea.vmem %s1680_s2, %s1164_s15 }
  0x20   : > { %s371_s10 = scalar_lea.vmem %s1707_s0, %s1100_s22  ;;  %s1529_s14 = scalar_lea.vmem %s1681_s3, %s1164_s15 }
  0x21   : > { %s1535_s22 = scalar_lea.vmem %s1682_s4, %s1167_s20  ;;  %s1540_s12 = scalar_lea.vmem %s1683_s5, %s1164_s15 }
  0x22   : > { %s399_s18 = scalar_lea.vmem %s1684_s6, %s1512_s21  ;;  %s367_s0 = scalar_lea.vmem [#allocation3], %s1507_s19 }
  0x23   : > { %404 = sbr.rel (%p1111_p0) target bundleno = 42 (0x2a), region = 52 }
  0x28   : > { %v405_v0 = vld [vmem:[%s371_s10] sm:$0xff]  ;;  %vm406_vm0 = vcmask 261120  }
  0x29   : > { %407 = vst.msk [vmem:[#allocation2] sm:$0xff] %vm406_vm0, %v405_v0 }
  0x2a PF: > { %v1170_v1 = vld [vmem:[%s376_s11 + $0x8] sm:$0xff]  ;;  %v1549_v2 = vld [vmem:[%s1540_s12] sm:$0xff]  ;;  %s1381_s24 = smov 32   ;;  %vm428_vm1 = vcmask 261120   ;;  %s1382_s26 = smov 96   ;;  %vm471_vm2 = vcmask 64512  }
  0x2b   : > { %438 = vmatpush.bf16.msra.mxu0 %v1170_v1  ;;  %v1169_v3 = vld [vmem:[%s376_s11] sm:$0xff]  ;;  %v448_v5 = vperm.slane %v1549_v2, 1  ;;  %v445_v12 = vperm.slane %v1549_v2, 0  ;;  %s1383_s8 = smov 88   ;;  %s1384_s11 = smov 120   ;;  %v455_v31 = vperm.slane %v1549_v2, 2 }
  0x2c   : > { %s1385_s17 = smov 80   ;;  %s1386_s10 = smov 104   ;;  %vm511_vm3 = vcmask 1043456   ;;  %v462_v44 = vld [vmem:[%s1524_s29] sm:$0xf]  ;;  %vm889_vm8 = vcmask 523264  }
  0x2d   : > { %450 = vrot.lane.b32.xlu0 %v448_v5, %s1381_s24  ;;  %s1387_s15 = smov 64   ;;  %s1388_s20 = smov 112   ;;  %v612_v45 = vsel %vm511_vm3, %v462_v44, 0 }
  0x2e   : > { %s1389_s23 = smov 72   ;;  %s1390_s9 = smov 48  }
  0x2f   : > { %439 = vmatpush.bf16.msra.mxu0 %v1169_v3  ;;  %s1391_s16 = smov 56   ;;  %s1392_s30 = smov 40  }
  0x30   : > { %v1551_v4 = vld [vmem:[#allocation2] sm:$0xff]  ;;  %p1159_p1 = scmp.ne.s32.totalorder %s1363_s27, 1 }
  0x31   : > { %v411_v6 = vpack.c.bf16 %v1551_v4, %v1551_v4 }
  0x33   : > { %1120 = vmatmul.msk.bf16.vlgmr.msra.gmra.mxu0 %vm428_vm1, %v411_v6 }
  0x9f   : > { %v451_v7 = vpop.permute.xlu0 %450 }
  0xb0   : > { %v441_v8 = vpop.f32.mrf.mxu0 }
  0xb1   : > { %v453_v9 = vadd.f32 %v451_v7, %v441_v8  ;;  %v446_v15 = vadd.f32 %v445_v12, %v441_v8 }
  0xb3   : > { %v454_v10 = vpack.c.bf16 %v453_v9, %v453_v9  ;;  %v447_v16 = vpack.c.bf16 %v446_v15, %v446_v15 }
  0xb5   : > { %v467_v11 = vunpack.c.l.b16 %v454_v10  ;;  %v530_v17 = vunpack.c.l.b16 %v447_v16 }
  0xb7   : > { %v468_v13 = vpack.c.b16 %v467_v11, %v467_v11  ;;  %v531_v18 = vpack.c.b16 %v530_v17, %v530_v17 }
  0xb8   : > { %v443_v14 = vpop.f32.mrf.mxu0 }
  0xb9   : > { %469 = vrot.lane.b32.xlu0 %v468_v13, %s1382_s26 }
  0xc1   : > { %534 = vrot.lane.b32.xlu0 %v468_v13, %s1383_s8 }
  0xc9   : > { %532 = vrot.lane.b32.xlu0 %v531_v18, %s1384_s11 }
  0xd1   : > { %629 = vrot.lane.b32.xlu0 %v468_v13, %s1385_s17 }
  0xd9   : > { %704 = vrot.lane.b32.xlu0 %v531_v18, %s1386_s10 }
 0x12b   : > { %v470_v19 = vpop.permute.xlu0 %469 }
 0x12c   : > { %v476_v20 = vsel %vm471_vm2, %v470_v19, 0 }
 0x12d   : > { %485 = vmatpush.bf16.xpose.msra.mxu1 %v476_v20 }
 0x133   : > { %v535_v21 = vpop.permute.xlu0 %534 }
 0x134   : > { %1121 = vmatmul.msk.bf16.vlgmr.msra.gmra.mxu1 %vm471_vm2, %v447_v16  ;;  %v540_v22 = vsel %vm471_vm2, %v535_v21, 0 }
 0x135   : > { %549 = vmatpush.bf16.xpose.msra.mxu3 %v540_v22  ;;  %621 = vmatpush.bf16.msrb.mxu1 %v612_v45 }
 0x13b   : > { %v533_v23 = vpop.permute.xlu0 %532 }
 0x13c   : > { %1123 = vmatmul.msk.bf16.vlgmr.msra.gmra.mxu3 %vm471_vm2, %v533_v23 }
 0x143   : > { %v630_v24 = vpop.permute.xlu0 %629 }
 0x144   : > { %v635_v25 = vsel %vm471_vm2, %v630_v24, 0 }
 0x145   : > { %644 = vmatpush.bf16.xpose.msrb.mxu3 %v635_v25 }
 0x14b   : > { %v705_v63 = vpop.permute.xlu0 %704 }
 0x1b1   : > { %v487_v26 = vpop.f32.mrf.mxu1 }
 0x1b2   : > { %v491_v27 = vsel %vm471_vm2, %v487_v26, -inf }
 0x1b3   : > { %492 = vmax.xlane.f32.xlu1 %v491_v27 }
 0x1b9   : > { %v489_v28 = vpop.f32.mrf.mxu1 }
 0x1bf   : > { %v551_v29 = vpop.f32.mrf.mxu3 }
 0x1c0   : > { %v555_v43 = vsel %vm471_vm2, %v551_v29, -inf }
 0x1c7   : > { %v553_v30 = vpop.f32.mrf.mxu3 }
 0x1cc   : > { %457 = vrot.lane.b32.xlu1 %v455_v31, %s1387_s15  ;;  %v463_v31 = vld [vmem:[%s1524_s29 + $0x4] sm:$0xf] }
 0x1d4   : > { %627 = vrot.lane.b32.xlu1 %v531_v18, %s1388_s20 }
 0x226   : > { %v493_v32 = vpop.xlane.xlu1 %492 }
 0x227   : > { %v494_v33 = vsub.f32 %v487_v26, %v493_v32  ;;  %v593_v32 = vsel %vm511_vm3, %v463_v31, 0 }
 0x228   : > { %602 = vmatpush.bf16.msrb.mxu0 %v593_v32 }
 0x229   : > { %v495_v34 = vmul.f32 1.442695, %v494_v33 }
 0x22b   : > { %1263 = vpow2.f32 %v495_v34 }
 0x231   : > { %v1264_v35 = vpop.eup %1263 }
 0x232   : > { %v497_v36 = vsel %vm471_vm2, %v1264_v35, 0.0 }
 0x233   : > { %498 = vadd.xlane.f32.xlu2 %v497_v36 }
 0x23e   : > { %v458_v37 = vpop.permute.xlu1 %457 }
 0x23f   : > { %v460_v38 = vadd.f32 %v458_v37, %v441_v8 }
 0x241   : > { %v461_v39 = vpack.c.bf16 %v460_v38, %v460_v38 }
 0x243   : > { %v504_v40 = vunpack.c.l.b16 %v461_v39  ;;  %v464_v39 = vld [vmem:[%s1524_s29 + $0x8] sm:$0xf] }
 0x245   : > { %v1567_v42 = vpack.c.b16 %v504_v40, %v504_v40  ;;  %v688_v40 = vsel %vm511_vm3, %v464_v39, 0 }
 0x246   : > { %v628_v41 = vpop.permute.xlu1 %627  ;;  %697 = vmatpush.bf16.msra.mxu0 %v688_v40 }
 0x247   : > { %1127 = vmatmul.msk.bf16.vlgmr.msrb.gmra.mxu3 %vm471_vm2, %v628_v41 }
 0x24b   : > { %506 = vrot.lane.b32.xlu2 %v1567_v42, %s1387_s15 }
 0x253   : > { %706 = vrot.lane.b32.xlu2 %v468_v13, %s1389_s23 }
 0x27c   : > { %556 = vmax.xlane.f32.xlu2 %v555_v43 }
 0x2a6   : > { %v499_v46 = vpop.xlane.xlu2 %498 }
 0x2a7   : > { %1265 = vrcp.f32 %v499_v46 }
 0x2ad   : > { %v1266_v47 = vpop.eup %1265 }
 0x2ae   : > { %v507_v48 = vpop.permute.xlu2 %506  ;;  %v501_v49 = vmul.f32 %v1266_v47, %v1264_v35  ;;  %v465_v47 = vld [vmem:[%s1524_s29 + $0xc] sm:$0xf] }
 0x2af   : > { %v513_v50 = vsel %vm511_vm3, %v507_v48, 0  ;;  %v765_v48 = vsel %vm511_vm3, %v465_v47, 0 }
 0x2b0   : > { %522 = vmatpush.bf16.msra.mxu2 %v513_v50  ;;  %v502_v51 = vpack.c.bf16 %v501_v49, %v501_v49 }
 0x2b3   : > { %1122 = vmatmul.msk.bf16.vlgmr.msra.gmra.mxu2 %vm471_vm2, %v502_v51 }
 0x2b6   : > { %v707_v52 = vpop.permute.xlu2 %706 }
 0x2b7   : > { %v712_v53 = vsel %vm471_vm2, %v707_v52, 0 }
 0x2b8   : > { %721 = vmatpush.bf16.xpose.msra.mxu1 %v712_v53 }
 0x2ca   : > { %v646_v54 = vpop.f32.mrf.mxu3 }
 0x2cb   : > { %v650_v55 = vsel %vm471_vm2, %v646_v54, -inf }
 0x2cc   : > { %651 = vmax.xlane.f32.xlu0 %v650_v55 }
 0x2d2   : > { %v648_v56 = vpop.f32.mrf.mxu3 }
 0x2ef   : > { %v557_v57 = vpop.xlane.xlu2 %556 }
 0x2f0   : > { %v558_v58 = vsub.f32 %v551_v29, %v557_v57 }
 0x2f2   : > { %v559_v59 = vmul.f32 1.442695, %v558_v58  ;;  %v781_v58 = vperm.slane %v1549_v2, 3 }
 0x2f4   : > { %1267 = vpow2.f32 %v559_v59 }
 0x2fa   : > { %v1268_v60 = vpop.eup %1267 }
 0x2fb   : > { %v561_v61 = vsel %vm471_vm2, %v1268_v60, 0.0 }
 0x2fc   : > { %562 = vadd.xlane.f32.xlu2 %v561_v61 }
 0x336   : > { %v524_v62 = vpop.f32.mrf.mxu2 }
 0x337   : > { %v528_v0 = vpack.c.bf16 %v524_v62, %v524_v62 }
 0x339   : > { %1126 = vmatmul.msk.bf16.vlgmr.msrb.gmra.mxu1 %vm471_vm2, %v528_v0 }
 0x33e   : > { %v526_v1 = vpop.f32.mrf.mxu2 }
 0x33f   : > { %v652_v3 = vpop.xlane.xlu0 %651  ;;  %v1393_v1 = vmov 32.0  }
 0x340   : > { %v653_v5 = vsub.f32 %v646_v54, %v652_v3 }
 0x342   : > { %v654_v6 = vmul.f32 1.442695, %v653_v5 }
 0x344   : > { %1269 = vpow2.f32 %v654_v6 }
 0x349   : > { %1130 = vmatmul.msk.bf16.vlgmr.msra.gmra.mxu1 %vm471_vm2, %v705_v63 }
 0x34a   : > { %v1270_v7 = vpop.eup %1269 }
 0x34b   : > { %v656_v8 = vsel %vm471_vm2, %v1270_v7, 0.0 }
 0x34c   : > { %657 = vadd.xlane.f32.xlu0 %v656_v8 }
 0x360   : > { %662 = vrot.lane.b32.xlu0 %v1567_v42, %s1390_s9 }
 0x36f   : > { %v563_v18 = vpop.xlane.xlu2 %562 }
 0x3b6   : > { %v1582_v9 = vpop.f32.mrf.mxu1 }
 0x3be   : > { %v625_v10 = vpop.f32.mrf.mxu1 }
 0x3bf   : > { %v658_v20 = vpop.xlane.xlu0 %657 }
 0x3c6   : > { %v723_v11 = vpop.f32.mrf.mxu1 }
 0x3c7   : > { %v727_v12 = vsel %vm471_vm2, %v723_v11, -inf }
 0x3c8   : > { %728 = vmax.xlane.f32.xlu1 %v727_v12 }
 0x3ce   : > { %v725_v13 = vpop.f32.mrf.mxu1 }
 0x3d2   : > { %v663_v23 = vpop.permute.xlu0 %662 }
 0x3d3   : > { %v668_v26 = vsel %vm511_vm3, %v663_v23, 0 }
 0x3e1   : > { %567 = vrot.lane.b32.xlu1 %v1567_v42, %s1391_s16 }
 0x43b   : > { %v729_v14 = vpop.xlane.xlu1 %728 }
 0x43c   : > { %v730_v15 = vsub.f32 %v723_v11, %v729_v14  ;;  %v1172_v14 = vld [vmem:[%s1529_s14 + $0x8] sm:$0xff] }
 0x43e   : > { %v731_v16 = vmul.f32 1.442695, %v730_v15  ;;  %v1171_v15 = vld [vmem:[%s1529_s14] sm:$0xff] }
 0x440   : > { %1271 = vpow2.f32 %v731_v16  ;;  %v1176_v16 = vld [vmem:[%s1535_s22 + $0x18] sm:$0xff] }
 0x441   : > { %1273 = vrcp.f32 %v563_v18  ;;  %897 = vmatpush.bf16.msrb.mxu1 %v1176_v16 }
 0x442   : > { %1275 = vrcp.f32 %v658_v20 }
 0x446   : > { %v1272_v17 = vpop.eup %1271 }
 0x447   : > { %v733_v19 = vsel %vm471_vm2, %v1272_v17, 0.0  ;;  %v1274_v21 = vpop.eup %1273 }
 0x448   : > { %734 = vadd.xlane.f32.xlu2 %v733_v19  ;;  %v565_v22 = vmul.f32 %v1274_v21, %v1268_v60  ;;  %v1276_v28 = vpop.eup %1275  ;;  %v1175_v19 = vld [vmem:[%s1535_s22 + $0x10] sm:$0xff] }
 0x449   : > { %v660_v29 = vmul.f32 %v1276_v28, %v1270_v7  ;;  %898 = vmatpush.bf16.msrb.mxu1 %v1175_v19 }
 0x44a   : > { %v566_v27 = vpack.c.bf16 %v565_v22, %v565_v22 }
 0x44b   : > { %v661_v30 = vpack.c.bf16 %v660_v29, %v660_v29  ;;  %v815_v29 = vperm.slane %v1549_v2, 6 }
 0x453   : > { %v568_v24 = vpop.permute.xlu1 %567 }
 0x454   : > { %v573_v25 = vsel %vm511_vm3, %v568_v24, 0 }
 0x455   : > { %582 = vmatpush.bf16.msrb.mxu2 %v573_v25 }
 0x458   : > { %1124 = vmatmul.msk.bf16.vlgmr.msrb.gmra.mxu2 %vm471_vm2, %v566_v27  ;;  %v813_v27 = vperm.slane %v1549_v2, 5 }
 0x459   : > { %677 = vmatpush.bf16.msra.mxu2 %v668_v26 }
 0x45d   : > { %774 = vmatpush.bf16.msrb.mxu2 %v765_v48 }
 0x460   : > { %739 = vrot.lane.b32.xlu2 %v1567_v42, %s1392_s30 }
 0x468   : > { %1128 = vmatmul.msk.bf16.vlgmr.msra.gmra.mxu2 %vm471_vm2, %v661_v30 }
 0x4bb   : > { %v735_v33 = vpop.xlane.xlu2 %734 }
 0x4bc   : > { %1277 = vrcp.f32 %v735_v33 }
 0x4bd   : > { %1279 = vrcp.f32 %v1393_v1 }
 0x4c2   : > { %v1278_v34 = vpop.eup %1277 }
 0x4c3   : > { %v737_v35 = vmul.f32 %v1278_v34, %v1272_v17  ;;  %v740_v36 = vpop.permute.xlu2 %739  ;;  %v1280_v3 = vpop.eup %1279  ;;  %v1174_v34 = vld [vmem:[%s1535_s22 + $0x8] sm:$0xff] }
 0x4c4   : > { %v745_v37 = vsel %vm511_vm3, %v740_v36, 0  ;;  %v788_v5 = vmul.f32 32.0, %v1280_v3  ;;  %vm792_vm4 = vweird.f32 %v1280_v3  ;;  %899 = vmatpush.bf16.msrb.mxu1 %v1174_v34  ;;  %v1261_v36 = vld [vmem:[%s399_s18] ss:$0 sm:$0xff] }
 0x4c5   : > { %v738_v38 = vpack.c.bf16 %v737_v35, %v737_v35  ;;  %754 = vmatpush.bf16.msra.mxu3 %v745_v37  ;;  %v1173_v35 = vld [vmem:[%s1535_s22] sm:$0xff] }
 0x4c6   : > { %v789_v6 = vsub.f32 1.0, %v788_v5 }
 0x4c8   : > { %1131 = vmatmul.msk.bf16.vlgmr.msra.gmra.mxu3 %vm471_vm2, %v738_v38  ;;  %v790_v7 = vmul.f32 %v1280_v3, %v789_v6  ;;  %900 = vmatpush.bf16.msrb.mxu1 %v1173_v35 }
 0x4ca   : > { %v791_v8 = vadd.f32 %v1280_v3, %v790_v7 }
 0x4db   : > { %v584_v41 = vpop.f32.mrf.mxu2 }
 0x4dc   : > { %v588_v42 = vpack.c.bf16 %v584_v41, %v584_v41 }
 0x4de   : > { %1125 = vmatmul.msk.bf16.vlgmr.msrb.gmra.mxu0 %vm471_vm2, %v588_v42  ;;  %v864_v42 = vperm.slane %v1549_v2, 4 }
 0x4df   : > { %847 = vmatpush.bf16.msrb.mxu0 %v1172_v14 }
 0x4e3   : > { %v586_v43 = vpop.f32.mrf.mxu2  ;;  %848 = vmatpush.bf16.msrb.mxu0 %v1171_v15 }
 0x4eb   : > { %v679_v44 = vpop.f32.mrf.mxu2 }
 0x4ec   : > { %v683_v45 = vpack.c.bf16 %v679_v44, %v679_v44 }
 0x4ee   : > { %1129 = vmatmul.msk.bf16.vlgmr.msra.gmra.mxu0 %vm471_vm2, %v683_v45 }
 0x4f3   : > { %v681_v46 = vpop.f32.mrf.mxu2 }
 0x54b   : > { %v756_v49 = vpop.f32.mrf.mxu3 }
 0x54c   : > { %v760_v50 = vpack.c.bf16 %v756_v49, %v756_v49 }
 0x54e   : > { %1132 = vmatmul.msk.bf16.vlgmr.msrb.gmra.mxu2 %vm471_vm2, %v760_v50 }
 0x553   : > { %v758_v51 = vpop.f32.mrf.mxu3 }
 0x55b   : > { %v604_v52 = vpop.f32.mrf.mxu0 }
 0x55c   : > { %v624_v54 = vadd.f32 %v1582_v9, %v604_v52  ;;  %v793_v9 = vsel %vm792_vm4, %v1280_v3, %v791_v8 }
 0x563   : > { %v606_v53 = vpop.f32.mrf.mxu0 }
 0x56b   : > { %v699_v55 = vpop.f32.mrf.mxu0 }
 0x56c   : > { %v703_v56 = vadd.f32 %v699_v55, %v624_v54 }
 0x573   : > { %v701_v57 = vpop.f32.mrf.mxu0 }
 0x5d1   : > { %v776_v59 = vpop.f32.mrf.mxu2 }
 0x5d2   : > { %v780_v60 = vadd.f32 %v776_v59, %v703_v56 }
 0x5d4   : > { %v782_v61 = vadd.f32 %v781_v58, %v780_v60 }
 0x5d6   : > { %v783_v62 = vadd.f32 %v782_v61, %v1551_v4 }
 0x5d8   : > { %v784_v63 = vsel %vm428_vm1, %v783_v62, 0.0 }
 0x5d9   : > { %v778_v0 = vpop.f32.mrf.mxu2  ;;  %785 = vadd.xlane.f32.xlu1 %v784_v63 }
 0x5da   : > { %v1262_v0 = vld [vmem:[%s1540_s12 + $0x8] ss:$0 sm:$0xff] }
 0x64c   : > { %v786_v10 = vpop.xlane.xlu1 %785 }
 0x64d   : > { %v794_v11 = vmul.f32 %v793_v9, %v786_v10 }
 0x64f   : > { %v795_v4 = vsub.f32 %v783_v62, %v794_v11  ;;  %v929_v62 = vperm.slane %v1549_v2, 7 }
 0x651   : > { %v796_v12 = vmul.f32 %v795_v4, %v795_v4 }
 0x653   : > { %v797_v13 = vsel %vm428_vm1, %v796_v12, 0.0 }
 0x654   : > { %798 = vadd.xlane.f32.xlu0 %v797_v13 }
 0x6c7   : > { %v799_v17 = vpop.xlane.xlu0 %798 }
 0x6c8   : > { %v800_v18 = vmul.f32 %v799_v17, %v793_v9 }
 0x6ca   : > { %v801_v20 = vadd.f32 1e-05, %v800_v18 }
 0x6cc   : > { %1281 = vrsqrt.f32 %v801_v20  ;;  %vm808_vm6 = vweird.f32 %v801_v20 }
 0x6d2   : > { %v1282_v21 = vpop.eup %1281 }
 0x6d3   : > { %v803_v22 = vmul.f32 %v1282_v21, %v801_v20  ;;  %vm809_vm5 = vweird.f32 %v1282_v21 }
 0x6d4   : > { %vm810_vm7 = vmor %vm808_vm6, %vm809_vm5 }
 0x6d5   : > { %v804_v23 = vmul.f32 %v1282_v21, %v803_v22 }
 0x6d7   : > { %v805_v24 = vmul.f32 0.5, %v804_v23 }
 0x6d9   : > { %v806_v25 = vsub.f32 1.5, %v805_v24 }
 0x6db   : > { %v807_v26 = vmul.f32 %v1282_v21, %v806_v25 }
 0x6dd   : > { %v811_v28 = vsel %vm810_vm7, %v1282_v21, %v807_v26 }
 0x6de   : > { %v812_v30 = vmul.f32 %v811_v28, %v795_v4 }
 0x6e0   : > { %v814_v31 = vmul.f32 %v813_v27, %v812_v30 }
 0x6e2   : > { %v816_v32 = vadd.f32 %v815_v29, %v814_v31 }
 0x6e4   : > { %v817_v33 = vpack.c.bf16 %v816_v32, %v816_v32 }
 0x6e6   : > { %1141 = vmatmul.msk.bf16.vlgmr.msrb.gmra.mxu0 %vm428_vm1, %v817_v33 }
 0x763   : > { %v850_v37 = vpop.f32.mrf.mxu0 }
 0x764   : > { %v851_v38 = vadd.f32 %v1261_v36, %v850_v37 }
 0x766   : > { %v854_v39 = vmax.f32 %v851_v38, 0.0 }
 0x768   : > { %v855_v40 = vpack.c.bf16 %v854_v39, %v854_v39 }
 0x76a   : > { %1158 = vmatmul.msk.bf16.vlgmr.msrb.gmra.mxu1 %vm889_vm8, %v855_v40 }
 0x76b   : > { %v852_v41 = vpop.f32.mrf.mxu0 }
 0x7e7   : > { %v902_v43 = vpop.f32.mrf.mxu1 }
 0x7e8   : > { %v903_v44 = vadd.f32 %v902_v43, %v864_v42 }
 0x7ea   : > { %v906_v45 = vadd.f32 %v903_v44, %v816_v32 }
 0x7ec   : > { %v907_v46 = vsel %vm428_vm1, %v906_v45, 0.0 }
 0x7ed   : > { %908 = vadd.xlane.f32.xlu2 %v907_v46 }
 0x7ef   : > { %v904_v47 = vpop.f32.mrf.mxu1 }
 0x860   : > { %v909_v48 = vpop.xlane.xlu2 %908 }
 0x861   : > { %v910_v49 = vmul.f32 %v909_v48, %v793_v9 }
 0x863   : > { %v911_v50 = vsub.f32 %v906_v45, %v910_v49 }
 0x865   : > { %v912_v51 = vmul.f32 %v911_v50, %v911_v50 }
 0x867   : > { %v913_v52 = vsel %vm428_vm1, %v912_v51, 0.0 }
 0x868   : > { %914 = vadd.xlane.f32.xlu1 %v913_v52 }
 0x8db   : > { %v915_v53 = vpop.xlane.xlu1 %914 }
 0x8dc   : > { %v916_v54 = vmul.f32 %v915_v53, %v793_v9 }
 0x8de   : > { %v917_v55 = vadd.f32 1e-05, %v916_v54 }
 0x8e0   : > { %1283 = vrsqrt.f32 %v917_v55  ;;  %vm924_vm10 = vweird.f32 %v917_v55 }
 0x8e6   : > { %v1284_v56 = vpop.eup %1283 }
 0x8e7   : > { %v919_v57 = vmul.f32 %v1284_v56, %v917_v55  ;;  %vm925_vm9 = vweird.f32 %v1284_v56 }
 0x8e8   : > { %vm926_vm11 = vmor %vm924_vm10, %vm925_vm9 }
 0x8e9   : > { %v920_v58 = vmul.f32 %v1284_v56, %v919_v57 }
 0x8eb   : > { %v921_v59 = vmul.f32 0.5, %v920_v58 }
 0x8ed   : > { %v922_v60 = vsub.f32 1.5, %v921_v59 }
 0x8ef   : > { %v923_v61 = vmul.f32 %v1284_v56, %v922_v60 }
 0x8f1   : > { %v927_v63 = vsel %vm926_vm11, %v1284_v56, %v923_v61 }
 0x8f2   : > { %v928_v1 = vmul.f32 %v927_v63, %v911_v50 }
 0x8f4   : > { %v930_v3 = vmul.f32 %v929_v62, %v928_v1  ;;  %937 = sbr.rel (%p1159_p1) target bundleno = 2298 (0x8fa), region = 56 }
 0x8f6   : > { %v932_v5 = vadd.f32 %v1262_v0, %v930_v3 }
 0x8f8   : > { %933 = vst.msk [vmem:[#allocation2] sm:$0xff] %vm428_vm1, %v932_v5 }
 0x8f9   : > { %938 = vst.msk [vmem:[%s367_s0] sm:$0xff] %vm428_vm1, %v932_v5 }
 0x8fa PF: > { %s1161_s21 = sshll.u32 %s1367_s28, 3  ;;  %s952_s24 = sshll.u32 %s367_s0, 4  ;;  %s953_s24 = int_to_ptr.vmem [resolvable:$true] %s952_s24 }
 0x8fb   : > { %s950_s18 = scalar_lea.hbm %s1685_s7, %s1161_s21  ;;  %s1708_s27 = sand.u32 1, %s1355_s25  }
 0x8fc   : > { %s954_s26 = sshll.u32 %s950_s18, 4  ;;  %s940_s8 = scalar_lea.sflag [#allocation4], %s1708_s27  ;;  %s955_s26 = int_to_ptr.hbm [resolvable:$true] %s954_s26 }
 0x8fd   : > { %s1299_s11 = sshra.s32 %s955_s26, 4  ;;  %s1305_s15 = scalar_lea.hbm %s1685_s7, 16  ;;  %s1300_s11 = int_to_ptr.hbm [resolvable:$true] %s1299_s11 }
 0x8fe   : > { %s1301_s17 = scalar_lea.hbm %s1300_s11, 8  ;;  %p1306_p6 = scmp.lt.s32.totalorder %s1300_s11, %s1685_s7 }
 0x8ff   : > { %p1302_p2 = scmp.ne.s32.totalorder %s1300_s11, %s1301_s17  ;;  %p1307_p7 = scmp.lt.s32.totalorder %s1305_s15, %s1301_s17 }
 0x901   : > { %p1303_p4 = pnand %p1302_p2, %p1483_p3  ;;  %p1308_p8 = por %p1307_p7, %p1306_p6 }
 0x903   : > { %p1304_p5 = pneg %p1303_p4 }
 0x905   : > { %p1309_p10 = pnand %p1308_p8, %p1304_p5 }
 0x907   : > { %1312 = shalt.err (!%p1309_p10)
}
 0x908   : > { %1177 = dma.vmem_to_hbm [thread:$0]  (%p1483_p3), %s953_s24, 128, %s955_s26, %s940_s8  }
 0x909 PF: > { %s1709_s0 = sld [smem:[#allocation10_spill]] }
 0x90a   : > { %s1710_s19 = sld [smem:[#allocation6_spill]] }
 0x90f   : > { %p1183_p11 = scmp.ge.s32.totalorder %s1709_s0, 2 }
 0x910   : > { %s966_s16 = sand.u32 1, %s1710_s19  }
 0x911   : > { %p1180_p12 = pnand %p1183_p11, %p1493_p9  ;;  %s967_s30 = scalar_lea.sflag [#allocation4], %s966_s16 }
 0x913   : > { %p1181_p13 = pneg %p1180_p12 }
 0x915   : > { %1346 = dma.done.wait (%p1181_p13), %s967_s30, 128  }
 0x916   : > { %1348 = vsyncadd (%p1181_p13), %s967_s30, 4294967168  ;;  %s20_s8 = sadd.s32 1, %s1709_s0   ;;  %s1712_s29 = sld [smem:[#allocation7_spill]] }
 0x917   : > { %p17_p0 = scmp.ge.s32.totalorder %s20_s8, 6   ;;  %s1713_s26 = sld [smem:[#allocation14_spill]] }
 0x918   : > { %s1714_s27 = sld [smem:[#allocation8_spill]]  ;;  %s1718_s24 = smov %s1355_s25 }
 0x919   : > { %s1715_s28 = sld [smem:[#allocation9_spill]] }
 0x91a   : > { %s1716_s13 = sld [smem:[#allocation11_spill]] }
 0x91b   : > { %s1717_s30 = sld [smem:[#allocation12_spill]] }
 0x91c   : > { %s1719_s25 = smov %s1712_s29  ;;  %19 = sbr.rel (!%p17_p0) target bundleno = 7 (0x7), region = 109 }
 0x920   : > { %s1720_s29 = smov %s1716_s13 }
 0x921   :  { %973 = vsyncpa [#allocation4], 1 }
 0x922   :  { %975 = vsyncpa [#allocation4 + $0x1], 1 }

</bundles_post_ra>
